<compile_context>
chip_gen: v7x
topology: tpu7x:2x2x1
jax: 0.10.0
libtpu: 0.0.40
codegen_flags: <defaults>
</compile_context>

<pallas_src>
import math
from functools import lru_cache

import jax
import jax.numpy as jnp
from jax.experimental import pallas as pl
from jax.experimental.pallas import tpu as pltpu

INPUT_DIM = 320
HIDDEN_DIM = 128
LATENT_DIM = 64
LATENT_PAD = 128          # latent padded to one full lane register (128)

MAX_BLOCK_ROWS = 2048     # large-batch row tile (multiple of 16)
_ROW_ALIGN = 16           # sublane alignment valid for both f32 and bf16 rows


def _round_up(n, m):
    return ((n + m - 1) // m) * m


@lru_cache(maxsize=1)
def _tensorcores_per_device():
    """2 for megacore-style chips (v7x, v4, v3); 1 for v5e / v6e."""
    try:
        kind = jax.devices()[0].device_kind.lower()
    except Exception:
        return 1
    return 2 if any(tag in kind for tag in ("v7", "v4", "v3")) else 1


def _plan_batch(batch, max_block_rows, num_cores):
    """Return (block_rows, num_blocks).

    No wrapper-side padding: the trailing block may be partial; Pallas clips
    the out-of-bounds rows on writeback and rows are independent, so garbage
    rows inside the tail tile never reach the output.
    """
    if num_cores >= 2:
        # Split across TensorCores once there is enough work per core.
        if batch > num_cores * _ROW_ALIGN:
            block = min(max_block_rows,
                        _round_up(-(-batch // num_cores), _ROW_ALIGN))
            return block, pl.cdiv(batch, block)
        return batch, 1
    # Single TensorCore: extra grid steps are pure per-step overhead.
    if batch <= max_block_rows:
        return batch, 1          # block == full array dim -> always a legal shape
    return max_block_rows, pl.cdiv(batch, max_block_rows)


def _autoencoder_kernel(x_ref,
                        w1_ref, b1_ref,
                        w2_ref, b2_ref,
                        w3_ref, b3_ref,
                        w4_ref, b4_ref,
                        o_ref):
    # One tile of batch rows; all four matmuls + ReLUs fused in-VMEM.
    # MXU runs in the weight dtype (bf16) with f32 accumulation; bias + ReLU
    # stay in f32, activations are re-cast to bf16 before the next dot.
    cdt = w1_ref.dtype

    x = x_ref[...].astype(cdt)

    # encoder
    h = jnp.dot(x, w1_ref[...], preferred_element_type=jnp.float32) + b1_ref[...]
    h = jnp.maximum(h, 0.0).astype(cdt)
    z = jnp.dot(h, w2_ref[...], preferred_element_type=jnp.float32) + b2_ref[...]
    z = jnp.maximum(z, 0.0).astype(cdt)

    # decoder
    d = jnp.dot(z, w3_ref[...], preferred_element_type=jnp.float32) + b3_ref[...]
    d = jnp.maximum(d, 0.0).astype(cdt)
    y = jnp.dot(d, w4_ref[...], preferred_element_type=jnp.float32) + b4_ref[...]

    o_ref[...] = y.astype(o_ref.dtype)


def init_params(key, input_dim=INPUT_DIM, hidden_dim=HIDDEN_DIM,
                latent_dim=LATENT_DIM, dtype=jnp.float32):
    """Deterministic init mimicking torch.nn.Linear (uniform +/- 1/sqrt(fan_in)).

    Weights are stored already transposed to (in_features, out_features).
    """
    dims = [(input_dim, hidden_dim),   # encoder.0
            (hidden_dim, latent_dim),  # encoder.2
            (latent_dim, hidden_dim),  # decoder.0
            (hidden_dim, input_dim)]   # decoder.2
    params = []
    for (fan_in, fan_out) in dims:
        key, kw, kb = jax.random.split(key, 3)
        bound = 1.0 / math.sqrt(fan_in)
        w = jax.random.uniform(kw, (fan_in, fan_out), dtype, -bound, bound)
        b = jax.random.uniform(kb, (1, fan_out), dtype, -bound, bound)
        params.append((w, b))
    return params


def prepare_kernel_params(params, weight_dtype=jnp.bfloat16):
    """One-time prep: pad the 64-wide latent to 128 (lane-dense middle
    matmuls; padded units are exactly zero so the forward pass is unchanged)
    and cast weights to bf16 for the MXU.  Biases stay f32 (added onto the
    f32 accumulator)."""
    (w1, b1), (w2, b2), (w3, b3), (w4, b4) = params
    pad = LATENT_PAD - LATENT_DIM
    w2p = jnp.pad(w2, ((0, 0), (0, pad)))   # (128, 128)
    b2p = jnp.pad(b2, ((0, 0), (0, pad)))   # (1, 128)
    w3p = jnp.pad(w3, ((0, pad), (0, 0)))   # (128, 128)

    def cvt(w, b):
        return w.astype(weight_dtype), b.astype(jnp.float32)

    return cvt(w1, b1), cvt(w2p, b2p), cvt(w3p, b3), cvt(w4, b4)


def esm_autoencoder_forward(x, kernel_params, *, max_block_rows=MAX_BLOCK_ROWS):
    """x: (B, 320) float32 or bfloat16.  kernel_params from prepare_kernel_params.

    Output dtype matches x.dtype (bf16 callers get the full 2x HBM-traffic win).
    """
    assert x.ndim == 2 and x.shape[1] == INPUT_DIM
    B = x.shape[0]
    (w1, b1), (w2, b2), (w3, b3), (w4, b4) = kernel_params

    block_rows, num_blocks = _plan_batch(B, max_block_rows,
                                         _tensorcores_per_device())
    grid = (num_blocks,)

    def const_spec(shape):
        # full-array block, same block every grid step -> fetched once, resident
        return pl.BlockSpec(shape, lambda i: (0,) * len(shape))

    weight_bytes = sum(int(a.size) * a.dtype.itemsize
                       for pair in kernel_params for a in pair)
    flops = 2 * B * (INPUT_DIM * HIDDEN_DIM + HIDDEN_DIM * LATENT_PAD +
                     LATENT_PAD * HIDDEN_DIM + HIDDEN_DIM * INPUT_DIM)
    bytes_accessed = 2 * B * INPUT_DIM * x.dtype.itemsize + weight_bytes

    out = pl.pallas_call(
        _autoencoder_kernel,
        out_shape=jax.ShapeDtypeStruct((B, INPUT_DIM), x.dtype),
        grid_spec=pltpu.PrefetchScalarGridSpec(
            num_scalar_prefetch=0,
            grid=grid,
            in_specs=[
                pl.BlockSpec((block_rows, INPUT_DIM), lambda i: (i, 0)),
                const_spec(w1.shape), const_spec(b1.shape),
                const_spec(w2.shape), const_spec(b2.shape),
                const_spec(w3.shape), const_spec(b3.shape),
                const_spec(w4.shape), const_spec(b4.shape),
            ],
            out_specs=pl.BlockSpec((block_rows, INPUT_DIM), lambda i: (i, 0)),
        ),
        compiler_params=pltpu.CompilerParams(
            dimension_semantics=("parallel",),
            # Headroom for 2048-row tiles; below physical VMEM on v5e/v6e
            # (128 MiB) and v7x (64 MiB).
            vmem_limit_bytes=48 * 1024 * 1024),
        cost_estimate=pl.CostEstimate(
            flops=flops, transcendentals=0, bytes_accessed=bytes_accessed),
    )(x, w1, b1, w2, b2, w3, b3, w4, b4)

    return out


def _reference_forward(x, params, compute_dtype=jnp.float32):
    """Pure-JAX reference.  With compute_dtype=bf16 it mirrors the kernel's
    cast placement exactly (bf16 operands, f32 accumulate, f32 bias/ReLU)."""
    (w1, b1), (w2, b2), (w3, b3), (w4, b4) = params

    def lin(a, w, b):
        return jnp.dot(a.astype(compute_dtype), w.astype(compute_dtype),
                       preferred_element_type=jnp.float32) + b.astype(jnp.float32)

    h = jnp.maximum(lin(x, w1, b1), 0.0)
    z = jnp.maximum(lin(h, w2, b2), 0.0)
    d = jnp.maximum(lin(z, w3, b3), 0.0)
    return lin(d, w4, b4)


if __name__ == "__main__":
    key = jax.random.PRNGKey(0)
    key_p, key_x1, key_x2, key_x3 = jax.random.split(key, 4)

    params = init_params(key_p)
    kparams = prepare_kernel_params(params)

    # 1) small f32 batch of "ESM embeddings": (16, 320)
    B1 = 16
    x1 = jax.random.normal(key_x1, (B1, INPUT_DIM), jnp.float32)
    out1 = jax.block_until_ready(esm_autoencoder_forward(x1, kparams))
    assert out1.shape == (B1, INPUT_DIM) and out1.dtype == jnp.float32
    ref1_mirror = _reference_forward(x1, params, compute_dtype=jnp.bfloat16)
    ref1_f32 = _reference_forward(x1, params, compute_dtype=jnp.float32)
    assert jnp.allclose(out1, ref1_mirror, atol=2e-3, rtol=2e-3), \
        "mismatch vs bf16-mirrored reference"
    assert jnp.allclose(out1, ref1_f32, atol=3e-2, rtol=3e-2), \
        "mismatch vs f32 reference"

    # 2) ragged bf16 batch: the bandwidth-optimal streaming path
    B2 = 20
    x2 = jax.random.normal(key_x2, (B2, INPUT_DIM), jnp.float32).astype(jnp.bfloat16)
    out2 = jax.block_until_ready(esm_autoencoder_forward(x2, kparams))
    assert out2.shape == (B2, INPUT_DIM) and out2.dtype == jnp.bfloat16
    ref2 = _reference_forward(x2.astype(jnp.float32), params,
                              compute_dtype=jnp.bfloat16)
    assert jnp.allclose(out2.astype(jnp.float32), ref2, atol=2e-2, rtol=2e-2), \
        "ragged bf16 mismatch"

    # 3) multi-tile grid with a partial trailing block (no wrapper pad/slice)
    B3 = 300
    x3 = jax.random.normal(key_x3, (B3, INPUT_DIM), jnp.float32)
    out3 = jax.block_until_ready(
        esm_autoencoder_forward(x3, kparams, max_block_rows=128))
    assert out3.shape == (B3, INPUT_DIM)
    ref3 = _reference_forward(x3, params, compute_dtype=jnp.bfloat16)
    assert jnp.allclose(out3, ref3, atol=2e-3, rtol=2e-3), \
        "partial-tail-block mismatch"

    print("KERNEL_OK")
</pallas_src>

<mosaic_0001>
module attributes {stable_mosaic.version = 11 : i64} {
  func.func @_autoencoder_kernel(%arg0: i32, %arg1: memref<16x320xf32, #tpu.memory_space<vmem>>, %arg2: memref<320x128xbf16, #tpu.memory_space<vmem>>, %arg3: memref<1x128xf32, #tpu.memory_space<vmem>>, %arg4: memref<128x128xbf16, #tpu.memory_space<vmem>>, %arg5: memref<1x128xf32, #tpu.memory_space<vmem>>, %arg6: memref<128x128xbf16, #tpu.memory_space<vmem>>, %arg7: memref<1x128xf32, #tpu.memory_space<vmem>>, %arg8: memref<128x320xbf16, #tpu.memory_space<vmem>>, %arg9: memref<1x320xf32, #tpu.memory_space<vmem>>, %arg10: memref<16x320xf32, #tpu.memory_space<vmem>>) attributes {dimension_semantics = [#tpu.dimension_semantics<parallel>], iteration_bounds = array<i64: 1>, scalar_prefetch = 0 : i64, scratch_operands = 0 : i64, tpu.core_type = #tpu.core_type<tc>, window_params = [{transform_indices = @transform_0, window_bounds = array<i64: 16, 320>}, {pipeline_mode = #tpu.pipeline_mode<synchronous>, transform_indices = @transform_1, window_bounds = array<i64: 320, 128>}, {pipeline_mode = #tpu.pipeline_mode<synchronous>, transform_indices = @transform_2, window_bounds = array<i64: 1, 128>}, {pipeline_mode = #tpu.pipeline_mode<synchronous>, transform_indices = @transform_3, window_bounds = array<i64: 128, 128>}, {pipeline_mode = #tpu.pipeline_mode<synchronous>, transform_indices = @transform_4, window_bounds = array<i64: 1, 128>}, {pipeline_mode = #tpu.pipeline_mode<synchronous>, transform_indices = @transform_5, window_bounds = array<i64: 128, 128>}, {pipeline_mode = #tpu.pipeline_mode<synchronous>, transform_indices = @transform_6, window_bounds = array<i64: 1, 128>}, {pipeline_mode = #tpu.pipeline_mode<synchronous>, transform_indices = @transform_7, window_bounds = array<i64: 128, 320>}, {pipeline_mode = #tpu.pipeline_mode<synchronous>, transform_indices = @transform_8, window_bounds = array<i64: 1, 320>}, {transform_indices = @transform_9, window_bounds = array<i64: 16, 320>}]} {
    %c0 = arith.constant 0 : index
    %c0_0 = arith.constant 0 : index
    %0 = vector.load %arg1[%c0, %c0_0] : memref<16x320xf32, #tpu.memory_space<vmem>>, vector<16x320xf32>
    %1 = arith.truncf %0 : vector<16x320xf32> to vector<16x320xbf16>
    %c0_1 = arith.constant 0 : index
    %c0_2 = arith.constant 0 : index
    %2 = vector.load %arg2[%c0_1, %c0_2] : memref<320x128xbf16, #tpu.memory_space<vmem>>, vector<320x128xbf16>
    %cst = arith.constant dense<0.000000e+00> : vector<16x128xf32>
    %3 = tpu.matmul %1, %2, %cst {dimension_numbers = #tpu.dot_dimension_numbers<[1], [0], [0], [1], [0, 0, 1, 1], [], []>} : vector<16x320xbf16>, vector<320x128xbf16>, vector<16x128xf32> -> vector<16x128xf32>
    %c0_3 = arith.constant 0 : index
    %c0_4 = arith.constant 0 : index
    %4 = vector.load %arg3[%c0_3, %c0_4] : memref<1x128xf32, #tpu.memory_space<vmem>>, vector<1x128xf32>
    %5 = vector.broadcast %4 : vector<1x128xf32> to vector<16x128xf32>
    %6 = arith.addf %3, %5 : vector<16x128xf32>
    %cst_5 = arith.constant 0.000000e+00 : f32
    %7 = vector.broadcast %cst_5 : f32 to vector<16x128xf32>
    %8 = arith.maximumf %6, %7 : vector<16x128xf32>
    %9 = arith.truncf %8 : vector<16x128xf32> to vector<16x128xbf16>
    %c0_6 = arith.constant 0 : index
    %c0_7 = arith.constant 0 : index
    %10 = vector.load %arg4[%c0_6, %c0_7] : memref<128x128xbf16, #tpu.memory_space<vmem>>, vector<128x128xbf16>
    %cst_8 = arith.constant dense<0.000000e+00> : vector<16x128xf32>
    %11 = tpu.matmul %9, %10, %cst_8 {dimension_numbers = #tpu.dot_dimension_numbers<[1], [0], [0], [1], [0, 0, 1, 1], [], []>} : vector<16x128xbf16>, vector<128x128xbf16>, vector<16x128xf32> -> vector<16x128xf32>
    %c0_9 = arith.constant 0 : index
    %c0_10 = arith.constant 0 : index
    %12 = vector.load %arg5[%c0_9, %c0_10] : memref<1x128xf32, #tpu.memory_space<vmem>>, vector<1x128xf32>
    %13 = vector.broadcast %12 : vector<1x128xf32> to vector<16x128xf32>
    %14 = arith.addf %11, %13 : vector<16x128xf32>
    %cst_11 = arith.constant 0.000000e+00 : f32
    %15 = vector.broadcast %cst_11 : f32 to vector<16x128xf32>
    %16 = arith.maximumf %14, %15 : vector<16x128xf32>
    %17 = arith.truncf %16 : vector<16x128xf32> to vector<16x128xbf16>
    %c0_12 = arith.constant 0 : index
    %c0_13 = arith.constant 0 : index
    %18 = vector.load %arg6[%c0_12, %c0_13] : memref<128x128xbf16, #tpu.memory_space<vmem>>, vector<128x128xbf16>
    %cst_14 = arith.constant dense<0.000000e+00> : vector<16x128xf32>
    %19 = tpu.matmul %17, %18, %cst_14 {dimension_numbers = #tpu.dot_dimension_numbers<[1], [0], [0], [1], [0, 0, 1, 1], [], []>} : vector<16x128xbf16>, vector<128x128xbf16>, vector<16x128xf32> -> vector<16x128xf32>
    %c0_15 = arith.constant 0 : index
    %c0_16 = arith.constant 0 : index
    %20 = vector.load %arg7[%c0_15, %c0_16] : memref<1x128xf32, #tpu.memory_space<vmem>>, vector<1x128xf32>
    %21 = vector.broadcast %20 : vector<1x128xf32> to vector<16x128xf32>
    %22 = arith.addf %19, %21 : vector<16x128xf32>
    %cst_17 = arith.constant 0.000000e+00 : f32
    %23 = vector.broadcast %cst_17 : f32 to vector<16x128xf32>
    %24 = arith.maximumf %22, %23 : vector<16x128xf32>
    %25 = arith.truncf %24 : vector<16x128xf32> to vector<16x128xbf16>
    %c0_18 = arith.constant 0 : index
    %c0_19 = arith.constant 0 : index
    %26 = vector.load %arg8[%c0_18, %c0_19] : memref<128x320xbf16, #tpu.memory_space<vmem>>, vector<128x320xbf16>
    %cst_20 = arith.constant dense<0.000000e+00> : vector<16x320xf32>
    %27 = tpu.matmul %25, %26, %cst_20 {dimension_numbers = #tpu.dot_dimension_numbers<[1], [0], [0], [1], [0, 0, 1, 1], [], []>} : vector<16x128xbf16>, vector<128x320xbf16>, vector<16x320xf32> -> vector<16x320xf32>
    %c0_21 = arith.constant 0 : index
    %c0_22 = arith.constant 0 : index
    %28 = vector.load %arg9[%c0_21, %c0_22] : memref<1x320xf32, #tpu.memory_space<vmem>>, vector<1x320xf32>
    %29 = vector.broadcast %28 : vector<1x320xf32> to vector<16x320xf32>
    %30 = arith.addf %27, %29 : vector<16x320xf32>
    %c0_23 = arith.constant 0 : index
    %c0_24 = arith.constant 0 : index
    %31 = vector.load %arg10[%c0_23, %c0_24] : memref<16x320xf32, #tpu.memory_space<vmem>>, vector<16x320xf32>
    tpu.vector_store %arg10[%c0_23, %c0_24], %30 {strides = array<i32>} : memref<16x320xf32, #tpu.memory_space<vmem>>, vector<16x320xf32>,
    return
  }
  func.func @transform_0(%arg0: i32) -> (i32, i32) {
    %c0_i32 = arith.constant 0 : i32
    %c0_i32_0 = arith.constant 0 : i32
    return %arg0, %c0_i32 : i32, i32
  }
  func.func @transform_1(%arg0: i32) -> (i32, i32) {
    %c0_i32 = arith.constant 0 : i32
    %c0_i32_0 = arith.constant 0 : i32
    %c0_i32_1 = arith.constant 0 : i32
    return %c0_i32, %c0_i32_0 : i32, i32
  }
  func.func @transform_2(%arg0: i32) -> (i32, i32) {
    %c0_i32 = arith.constant 0 : i32
    %c0_i32_0 = arith.constant 0 : i32
    %c0_i32_1 = arith.constant 0 : i32
    return %c0_i32, %c0_i32_0 : i32, i32
  }
  func.func @transform_3(%arg0: i32) -> (i32, i32) {
    %c0_i32 = arith.constant 0 : i32
    %c0_i32_0 = arith.constant 0 : i32
    %c0_i32_1 = arith.constant 0 : i32
    return %c0_i32, %c0_i32_0 : i32, i32
  }
  func.func @transform_4(%arg0: i32) -> (i32, i32) {
    %c0_i32 = arith.constant 0 : i32
    %c0_i32_0 = arith.constant 0 : i32
    %c0_i32_1 = arith.constant 0 : i32
    return %c0_i32, %c0_i32_0 : i32, i32
  }
  func.func @transform_5(%arg0: i32) -> (i32, i32) {
    %c0_i32 = arith.constant 0 : i32
    %c0_i32_0 = arith.constant 0 : i32
    %c0_i32_1 = arith.constant 0 : i32
    return %c0_i32, %c0_i32_0 : i32, i32
  }
  func.func @transform_6(%arg0: i32) -> (i32, i32) {
    %c0_i32 = arith.constant 0 : i32
    %c0_i32_0 = arith.constant 0 : i32
    %c0_i32_1 = arith.constant 0 : i32
    return %c0_i32, %c0_i32_0 : i32, i32
  }
  func.func @transform_7(%arg0: i32) -> (i32, i32) {
    %c0_i32 = arith.constant 0 : i32
    %c0_i32_0 = arith.constant 0 : i32
    %c0_i32_1 = arith.constant 0 : i32
    return %c0_i32, %c0_i32_0 : i32, i32
  }
  func.func @transform_8(%arg0: i32) -> (i32, i32) {
    %c0_i32 = arith.constant 0 : i32
    %c0_i32_0 = arith.constant 0 : i32
    %c0_i32_1 = arith.constant 0 : i32
    return %c0_i32, %c0_i32_0 : i32, i32
  }
  func.func @transform_9(%arg0: i32) -> (i32, i32) {
    %c0_i32 = arith.constant 0 : i32
    %c0_i32_0 = arith.constant 0 : i32
    return %arg0, %c0_i32 : i32, i32
  }
}

</mosaic_0001>

<bundles_post_ra>
// kernel: tpu_custom_call.1
= control target key start
LH: loop header
LB: loop body
LE: loop exit
PB: predicated region body
PF: predicated region fallthrough
CT: control target
= control target key end

     0   :  { %v1100_v2 = vmov 0.0   ;;  %vm1101_vm0 = vmmov 0   ;;  %vm210_vm1 = vcmask 523264   ;;  %s1417_s0 = inlined_call_operand.vmem [shape: f32[16,320], index: 0, kind: input, shape index: {}]   ;;  %s1418_s1 = inlined_call_operand.vmem [shape: bf16[320,128], index: 1, kind: input, shape index: {}]   ;;  %s1419_s2 = inlined_call_operand.vmem [shape: f32[1,128], index: 2, kind: input, shape index: {}]   ;;  %s1420_s3 = inlined_call_operand.vmem [shape: bf16[128,128], index: 3, kind: input, shape index: {}]   ;;  %s1421_s4 = inlined_call_operand.vmem [shape: f32[1,128], index: 4, kind: input, shape index: {}]   ;;  %s1422_s5 = inlined_call_operand.vmem [shape: bf16[128,128], index: 5, kind: input, shape index: {}]   ;;  %s1423_s6 = inlined_call_operand.vmem [shape: f32[1,128], index: 6, kind: input, shape index: {}]   ;;  %s1424_s7 = inlined_call_operand.vmem [shape: bf16[128,320], index: 7, kind: input, shape index: {}]   ;;  %s1425_s8 = inlined_call_operand.vmem [shape: f32[1,320], index: 8, kind: input, shape index: {}]   ;;  %s1426_s9 = inlined_call_operand.hbm [shape: f32[16,320], index: 9, kind: output, shape index: {}]  }
   0x1   :  { %v1008_v0 = vld [vmem:[%s1418_s1 + $0x40] sm:$0xff]   ;;  %930 = vmatprep.subr.bf16.mxu1 %v1100_v2  ;;  %v1010_v3 = vld [vmem:[%s1418_s1 + $0x48] sm:$0xff]   ;;  %938 = vmatprep.mubr.msk.bf16.mxu1 %vm1101_vm0, %v1100_v2  ;;  %v1012_v5 = vld [vmem:[%s1418_s1 + $0x50] sm:$0xff]  }
   0x2   :  { %v1009_v1 = vld [vmem:[%s1418_s1] sm:$0xff]   ;;  %876 = vmatprep.subr.bf16.mxu0 %v1008_v0  ;;  %v1011_v4 = vld [vmem:[%s1418_s1 + $0x8] sm:$0xff]   ;;  %v1013_v6 = vld [vmem:[%s1418_s1 + $0x10] sm:$0xff]  }
   0x3   :  { %877 = vmatpush3.bf16.msra.mxu0 %v1009_v1  ;;  %v1014_v7 = vld [vmem:[%s1418_s1 + $0x58] sm:$0xff]   ;;  %v1018_v8 = vld [vmem:[%s1418_s1 + $0x80] sm:$0xff]   ;;  %v1021_v11 = vld [vmem:[%s1418_s1 + $0x88] sm:$0xff]  }
   0x4   :  { %878 = vmatprep.subr.bf16.mxu0 %v1010_v3  ;;  %v1015_v9 = vld [vmem:[%s1418_s1 + $0x18] sm:$0xff]   ;;  %v1016_v10 = vld [vmem:[%s1418_s1 + $0x60] sm:$0xff]   ;;  %931 = vmatpush3.bf16.msra.mxu1 %v1018_v8  ;;  %v1019_v13 = vld [vmem:[%s1418_s1 + $0x68] sm:$0xff]  }
   0x5   :  { %932 = vmatprep.subr.bf16.mxu1 %v1100_v2  ;;  %v1017_v12 = vld [vmem:[%s1418_s1 + $0x20] sm:$0xff]   ;;  %v1024_v14 = vld [vmem:[%s1418_s1 + $0x90] sm:$0xff]   ;;  %v1020_v15 = vld [vmem:[%s1418_s1 + $0x28] sm:$0xff]  }
   0x6   :  { %v35_v16 = vld [vmem:[%s1417_s0 + $0x8] sm:$0xff]  ;;  %v38_v17 = vld [vmem:[%s1417_s0 + $0x20] sm:$0xff]  ;;  %v1022_v18 = vld [vmem:[%s1418_s1 + $0x70] sm:$0xff]  }
   0x7   :  { %879 = vmatpush3.bf16.msra.mxu0 %v1011_v4  ;;  %v41_v19 = vpack.c.bf16 %v38_v17, %v35_v16  ;;  %v1027_v20 = vld [vmem:[%s1418_s1 + $0x98] sm:$0xff]   ;;  %v36_v21 = vld [vmem:[%s1417_s0 + $0x10] sm:$0xff]  ;;  %v39_v22 = vld [vmem:[%s1417_s0 + $0x28] sm:$0xff] }
   0x8   :  { %880 = vmatprep.subr.bf16.mxu0 %v1012_v5  ;;  %933 = vmatpush3.bf16.msra.mxu1 %v1021_v11  ;;  %v1023_v23 = vld [vmem:[%s1418_s1 + $0x30] sm:$0xff]   ;;  %v1025_v24 = vld [vmem:[%s1418_s1 + $0x78] sm:$0xff]   ;;  %v42_v25 = vpack.c.bf16 %v39_v22, %v36_v21  ;;  %v1028_v26 = vld [vmem:[%s1420_s3] sm:$0xff]  }
   0x9   :  { %934 = vmatprep.subr.bf16.mxu1 %v1100_v2  ;;  %246 = vmatprep.mubr.bf16.mxu0 %v41_v19  ;;  %v1026_v27 = vld [vmem:[%s1418_s1 + $0x38] sm:$0xff]   ;;  %v34_v28 = vld [vmem:[%s1417_s0] sm:$0xff]  ;;  %v1029_v30 = vld [vmem:[%s1420_s3 + $0x8] sm:$0xff]  }
   0xa   :  { %v37_v29 = vld [vmem:[%s1417_s0 + $0x18] sm:$0xff]  ;;  %v1030_v32 = vld [vmem:[%s1420_s3 + $0x10] sm:$0xff]   ;;  %v1032_v34 = vld [vmem:[%s1420_s3 + $0x20] sm:$0xff]  }
   0xb   :  { %881 = vmatpush3.bf16.msra.mxu0 %v1013_v6  ;;  %v40_v31 = vpack.c.bf16 %v37_v29, %v34_v28  ;;  %v1031_v33 = vld [vmem:[%s1420_s3 + $0x18] sm:$0xff]  }
   0xc   :  { %882 = vmatprep.subr.bf16.mxu0 %v1014_v7  ;;  %935 = vmatpush3.bf16.msra.mxu1 %v1024_v14 }
   0xd   :  { %936 = vmatprep.subr.bf16.mxu1 %v1100_v2 }
   0xf   :  { %883 = vmatpush3.bf16.msra.mxu0 %v1015_v9 }
  0x10   :  { %884 = vmatprep.subr.bf16.mxu0 %v1016_v10  ;;  %937 = vmatpush3.bf16.msra.mxu1 %v1027_v20 }
  0x11   :  { %942 = vmatprep.subr.bf16.mxu1 %v1100_v2 }
  0x13   :  { %885 = vmatpush3.bf16.msra.mxu0 %v1017_v12  ;;  %939 = vmatmul.mubr.msk.bf16.vlgmr.msra.gmra.mrb[0].mxu1 %vm210_vm1, %v42_v25 }
  0x14   :  { %886 = vmatprep.subr.bf16.mxu0 %v1019_v13  ;;  %943 = vmatpush3.bf16.msra.mxu1 %v1028_v26 }
  0x15   :  { %944 = vmatprep.subr.bf16.mxu1 %v1100_v2  ;;  %958 = vmatprep.mubr.msk.bf16.mxu1 %vm1101_vm0, %v1100_v2 }
  0x17   :  { %887 = vmatpush3.bf16.msra.mxu0 %v1020_v15 }
  0x18   :  { %888 = vmatprep.subr.bf16.mxu0 %v1022_v18  ;;  %945 = vmatpush3.bf16.msra.mxu1 %v1029_v30 }
  0x19   :  { %946 = vmatprep.subr.bf16.mxu1 %v1100_v2 }
  0x1b   :  { %889 = vmatpush3.bf16.msra.mxu0 %v1023_v23 }
  0x1c   :  { %890 = vmatprep.subr.bf16.mxu0 %v1025_v24  ;;  %947 = vmatpush3.bf16.msra.mxu1 %v1030_v32 }
  0x1d   :  { %948 = vmatprep.subr.bf16.mxu1 %v1100_v2 }
  0x1f   :  { %891 = vmatpush3.bf16.msra.mxu0 %v1026_v27 }
  0x20   :  { %962 = vmatprep.subr.bf16.mxu0 %v1100_v2  ;;  %949 = vmatpush3.bf16.msra.mxu1 %v1031_v33 }
  0x21   :  { %950 = vmatprep.subr.bf16.mxu1 %v1100_v2 }
  0x22   :  { %247 = vmatmul.mubr.bf16.vlgmr.msra.gmra.mrb[0].mxu0 %v40_v31 }
  0x23   :  { %978 = vmatprep.mubr.msk.bf16.mxu0 %vm1101_vm0, %v1100_v2 }
  0x24   :  { %951 = vmatpush3.bf16.msra.mxu1 %v1032_v34 }
  0x25   :  { %952 = vmatprep.subr.bf16.mxu1 %v1100_v2 }
  0x26   :  { %14 = vsyncpa [#allocation3], 0  ;;  %v1033_v35 = vld [vmem:[%s1420_s3 + $0x28] sm:$0xff]   ;;  %v1034_v36 = vld [vmem:[%s1420_s3 + $0x30] sm:$0xff]  }
  0x27   :  { %v1035_v37 = vld [vmem:[%s1420_s3 + $0x38] sm:$0xff]   ;;  %v1036_v38 = vld [vmem:[%s1422_s5] sm:$0xff]   ;;  %v1037_v39 = vld [vmem:[%s1422_s5 + $0x8] sm:$0xff]  }
  0x28   :  { %953 = vmatpush3.bf16.msra.mxu1 %v1033_v35  ;;  %963 = vmatpush3.bf16.msra.mxu0 %v1036_v38  ;;  %v1038_v40 = vld [vmem:[%s1422_s5 + $0x10] sm:$0xff]   ;;  %v1039_v41 = vld [vmem:[%s1422_s5 + $0x18] sm:$0xff]   ;;  %v1040_v42 = vld [vmem:[%s1422_s5 + $0x20] sm:$0xff]   ;;  %v1102_v35 = vmov 0  }
  0x29   :  { %954 = vmatprep.subr.bf16.mxu1 %v1100_v2  ;;  %964 = vmatprep.subr.bf16.mxu0 %v1100_v2  ;;  %v1041_v43 = vld [vmem:[%s1422_s5 + $0x28] sm:$0xff]   ;;  %v812_v50 = vld [vmem:[%s1419_s2] ss:$0 sm:$0xff]  ;;  %v1042_v62 = vld [vmem:[%s1422_s5 + $0x30] sm:$0xff]  }
  0x2a   :  { %v1043_v63 = vld [vmem:[%s1422_s5 + $0x38] sm:$0xff]   ;;  %v1044_v0 = vld [vmem:[%s1424_s7] ss:$12 sps:$4 sm:$0xff]   ;;  %v1046_v1 = vld [vmem:[%s1424_s7 + $0x4] ss:$12 sps:$4 sm:$0xff]  }
  0x2b   :  { %v1050_v3 = vld [vmem:[%s1424_s7 + $0x1c] ss:$12 sps:$4 sm:$0xff]   ;;  %v1048_v4 = vld [vmem:[%s1424_s7 + $0x18] ss:$12 sps:$4 sm:$0xff]   ;;  %v1054_v5 = vld [vmem:[%s1424_s7 + $0x34] ss:$12 sps:$4 sm:$0xff]  }
  0x2c   :  { %955 = vmatpush3.bf16.msra.mxu1 %v1034_v36  ;;  %965 = vmatpush3.bf16.msra.mxu0 %v1037_v39  ;;  %v1052_v6 = vld [vmem:[%s1424_s7 + $0x30] ss:$12 sps:$4 sm:$0xff]   ;;  %v1058_v7 = vld [vmem:[%s1424_s7 + $0x4c] ss:$12 sps:$4 sm:$0xff]   ;;  %v1056_v8 = vld [vmem:[%s1424_s7 + $0x48] ss:$12 sps:$4 sm:$0xff]  }
  0x2d   :  { %956 = vmatprep.subr.bf16.mxu1 %v1100_v2  ;;  %966 = vmatprep.subr.bf16.mxu0 %v1100_v2  ;;  %v1062_v9 = vld [vmem:[%s1424_s7 + $0x64] ss:$12 sps:$4 sm:$0xff]   ;;  %v1060_v10 = vld [vmem:[%s1424_s7 + $0x60] ss:$12 sps:$4 sm:$0xff]   ;;  %v1066_v11 = vld [vmem:[%s1424_s7 + $0x7c] ss:$12 sps:$4 sm:$0xff]  }
  0x2e   :  { %v1064_v12 = vld [vmem:[%s1424_s7 + $0x78] ss:$12 sps:$4 sm:$0xff]   ;;  %v834_v13 = vld [vmem:[%s1421_s4] ss:$0 sm:$0xff]  ;;  %v1047_v22 = vld [vmem:[%s1424_s7 + $0x8] ss:$12 sps:$4 sm:$0xff]  }
  0x2f   :  { %v1051_v24 = vld [vmem:[%s1424_s7 + $0x20] ss:$12 sps:$4 sm:$0xff]   ;;  %v1055_v25 = vld [vmem:[%s1424_s7 + $0x38] ss:$12 sps:$4 sm:$0xff]   ;;  %v1059_v26 = vld [vmem:[%s1424_s7 + $0x50] ss:$12 sps:$4 sm:$0xff]  }
  0x30   :  { %957 = vmatpush3.bf16.msra.mxu1 %v1035_v37  ;;  %967 = vmatpush3.bf16.msra.mxu0 %v1038_v40  ;;  %v1063_v27 = vld [vmem:[%s1424_s7 + $0x68] ss:$12 sps:$4 sm:$0xff]   ;;  %v1067_v28 = vld [vmem:[%s1424_s7 + $0x80] ss:$12 sps:$4 sm:$0xff]   ;;  %v1068_v30 = vld [vmem:[%s1424_s7 + $0x90] ss:$12 sps:$4 sm:$0xff]  }
  0x31   :  { %968 = vmatprep.subr.bf16.mxu0 %v1100_v2  ;;  %706 = vmatprep.subr.bf16.mxu1 %v1046_v1  ;;  %v1070_v29 = vld [vmem:[%s1424_s7 + $0x94] ss:$12 sps:$4 sm:$0xff]   ;;  %v1071_v31 = vld [vmem:[%s1424_s7 + $0x98] ss:$12 sps:$4 sm:$0xff]   ;;  %v1075_v34 = vld [vmem:[%s1424_s7 + $0xb0] ss:$12 sps:$4 sm:$0xff]  }
  0x32   :  { %v1074_v32 = vld [vmem:[%s1424_s7 + $0xac] ss:$12 sps:$4 sm:$0xff]   ;;  %v1072_v33 = vld [vmem:[%s1424_s7 + $0xa8] ss:$12 sps:$4 sm:$0xff]   ;;  %v843_v36 = vld [vmem:[%s1423_s6] ss:$0 sm:$0xff] }
  0x33   :  { %s1103_s6 = smov [#allocation2]  }
  0x34   :  { %969 = vmatpush3.bf16.msra.mxu0 %v1039_v41  ;;  %s801_s26 = sshll.u32 %s1103_s6, 4  ;;  %s802_s26 = int_to_ptr.vmem [resolvable:$true] %s801_s26 }
  0x35   :  { %970 = vmatprep.subr.bf16.mxu0 %v1100_v2  ;;  %p1081_p1 = scmp.lt.s32.totalorder %s802_s26, %s802_s26 }
  0x38   :  { %971 = vmatpush3.bf16.msra.mxu0 %v1040_v42 }
  0x39   :  { %972 = vmatprep.subr.bf16.mxu0 %v1100_v2 }
  0x3c   :  { %973 = vmatpush3.bf16.msra.mxu0 %v1041_v43 }
  0x3d   :  { %974 = vmatprep.subr.bf16.mxu0 %v1100_v2 }
  0x40   :  { %975 = vmatpush3.bf16.msra.mxu0 %v1042_v62 }
  0x41   :  { %976 = vmatprep.subr.bf16.mxu0 %v1100_v2 }
  0x44   :  { %977 = vmatpush3.bf16.msra.mxu0 %v1043_v63 }
  0x45   :  { %982 = vmatprep.subr.bf16.mxu0 %v1100_v2 }
  0xe6   :  { %v289_v44 = vpop.f32.mrb[0].mxu1 }
  0xe7   :  { %v940_v45 = vpop.f32.mrb[1].mxu1 }
  0xe8   :  { %v292_v46 = vpop.f32.mrb[2].mxu1  ;;  %v563_v45 = vlaneseq }
  0xe9   :  { %v941_v47 = vpop.f32.mrb[3].mxu1 }
  0xf5   :  { %v892_v48 = vpop.f32.mrb[0].mxu0 }
  0xf6   :  { %v893_v49 = vpop.f32.mrb[1].mxu0 }
  0xf7   :  { %v894_v51 = vadd.f32 %v893_v49, %v892_v48  ;;  %v895_v52 = vpop.f32.mrb[2].mxu0  ;;  %v561_v49 = vld [vmem:[%s1425_s8] sm:$0x7]  ;;  %s1076_s8 = scalar_lea.vmem %s802_s26, 768 }
  0xf8   :  { %v896_v53 = vpop.f32.mrb[3].mxu0  ;;  %p1077_p0 = scmp.ne.s32.totalorder %s802_s26, %s1076_s8  ;;  %p1082_p2 = scmp.lt.s32.totalorder %s1076_s8, %s1076_s8 }
  0xf9   :  { %v249_v54 = vadd.f32 %v894_v51, %v812_v50  ;;  %v897_v55 = vadd.f32 %v896_v53, %v895_v52 }
  0xfa   :  { %p1083_p3 = por %p1082_p2, %p1081_p1 }
  0xfb   :  { %v290_v56 = vadd.f32 %v289_v44, %v249_v54  ;;  %v252_v57 = vadd.f32 %v897_v55, %v812_v50 }
  0xfc   :  { %p1084_p4 = pnand %p1083_p3, %p1077_p0 }
  0xfd   :  { %v293_v58 = vadd.f32 %v292_v46, %v252_v57  ;;  %v296_v59 = vmax.f32 %v290_v56, 0.0  ;;  %v564_v46 = vshrl.u32 %v563_v45, 7 }
  0xff   :  { %v297_v60 = vmax.f32 %v293_v58, 0.0  ;;  %v565_v47 = vsub.s32 0, %v564_v46  ;;  %v573_v48 = vsub.s32 2, %v564_v46  ;;  %v569_v50 = vsub.s32 1, %v564_v46 }
 0x101   :  { %v298_v61 = vpack.c.bf16 %v297_v60, %v296_v59  ;;  %v566_v51 = vrot.slane %v561_v49, %v565_v47  ;;  %v574_v52 = vrot.slane %v561_v49, %v573_v48  ;;  %v570_v53 = vrot.slane %v561_v49, %v569_v50 }
 0x103   :  { %959 = vmatmul.mubr.bf16.vlgmr.msra.gmra.mrb[4].mxu1 %v298_v61 }
 0x104   :  { %707 = vmatpush1.bf16.msra.mxu1 %v1044_v0  ;;  %738 = vmatprep.mubr.bf16.mxu1 %v1102_v35 }
 0x105   :  { %708 = vmatprep.subr.bf16.mxu1 %v1050_v3 }
 0x108   :  { %709 = vmatpush1.bf16.msra.mxu1 %v1048_v4 }
 0x109   :  { %710 = vmatprep.subr.bf16.mxu1 %v1054_v5 }
 0x10c   :  { %711 = vmatpush1.bf16.msra.mxu1 %v1052_v6 }
 0x10d   :  { %712 = vmatprep.subr.bf16.mxu1 %v1058_v7 }
 0x110   :  { %713 = vmatpush1.bf16.msra.mxu1 %v1056_v8 }
 0x111   :  { %714 = vmatprep.subr.bf16.mxu1 %v1062_v9 }
 0x114   :  { %715 = vmatpush1.bf16.msra.mxu1 %v1060_v10 }
 0x115   :  { %716 = vmatprep.subr.bf16.mxu1 %v1066_v11 }
 0x118   :  { %717 = vmatpush1.bf16.msra.mxu1 %v1064_v12 }
 0x119   :  { %718 = vmatprep.subr.bf16.mxu1 %v1070_v29 }
 0x11c   :  { %719 = vmatpush1.bf16.msra.mxu1 %v1068_v30 }
 0x11d   :  { %720 = vmatprep.subr.bf16.mxu1 %v1074_v32 }
 0x120   :  { %721 = vmatpush1.bf16.msra.mxu1 %v1072_v33 }
 0x1d6   :  { %v404_v14 = vpop.f32.mrb[4].mxu1 }
 0x1d7   :  { %v405_v15 = vadd.f32 %v834_v13, %v404_v14  ;;  %v960_v16 = vpop.f32.mrb[5].mxu1 }
 0x1d8   :  { %v407_v17 = vpop.f32.mrb[6].mxu1 }
 0x1d9   :  { %v408_v18 = vadd.f32 %v834_v13, %v407_v17  ;;  %v961_v19 = vpop.f32.mrb[7].mxu1  ;;  %v411_v20 = vmax.f32 %v405_v15, 0.0 }
 0x1db   :  { %v412_v21 = vmax.f32 %v408_v18, 0.0 }
 0x1dd   :  { %v413_v23 = vpack.c.bf16 %v412_v21, %v411_v20 }
 0x1df   :  { %979 = vmatmul.mubr.bf16.vlgmr.msra.gmra.mrb[4].mxu0 %v413_v23 }
 0x1e0   :  { %983 = vmatpush3.bf16.msra.mxu0 %v1047_v22  ;;  %998 = vmatprep.mubr.msk.bf16.mxu0 %vm1101_vm0, %v1100_v2 }
 0x1e1   :  { %984 = vmatprep.subr.bf16.mxu0 %v1100_v2 }
 0x1e4   :  { %985 = vmatpush3.bf16.msra.mxu0 %v1051_v24 }
 0x1e5   :  { %986 = vmatprep.subr.bf16.mxu0 %v1100_v2 }
 0x1e8   :  { %987 = vmatpush3.bf16.msra.mxu0 %v1055_v25 }
 0x1e9   :  { %988 = vmatprep.subr.bf16.mxu0 %v1100_v2 }
 0x1ec   :  { %989 = vmatpush3.bf16.msra.mxu0 %v1059_v26 }
 0x1ed   :  { %990 = vmatprep.subr.bf16.mxu0 %v1100_v2 }
 0x1f0   :  { %991 = vmatpush3.bf16.msra.mxu0 %v1063_v27 }
 0x1f1   :  { %992 = vmatprep.subr.bf16.mxu0 %v1100_v2 }
 0x1f4   :  { %993 = vmatpush3.bf16.msra.mxu0 %v1067_v28 }
 0x1f5   :  { %994 = vmatprep.subr.bf16.mxu0 %v1100_v2 }
 0x1f8   :  { %995 = vmatpush3.bf16.msra.mxu0 %v1071_v31 }
 0x1f9   :  { %996 = vmatprep.subr.bf16.mxu0 %v1100_v2 }
 0x1fc   :  { %997 = vmatpush3.bf16.msra.mxu0 %v1075_v34 }
 0x2b2   :  { %v519_v37 = vpop.f32.mrb[4].mxu0 }
 0x2b3   :  { %v520_v38 = vadd.f32 %v843_v36, %v519_v37  ;;  %v980_v2 = vpop.f32.mrb[5].mxu0 }
 0x2b4   :  { %v522_v39 = vpop.f32.mrb[6].mxu0 }
 0x2b5   :  { %v523_v40 = vadd.f32 %v843_v36, %v522_v39  ;;  %v981_v41 = vpop.f32.mrb[7].mxu0  ;;  %v526_v42 = vmax.f32 %v520_v38, 0.0 }
 0x2b7   :  { %v527_v43 = vmax.f32 %v523_v40, 0.0 }
 0x2b9   :  { %v528_v44 = vpack.c.bf16 %v527_v43, %v526_v42 }
 0x2bb   :  { %739 = vmatmul.mubr.bf16.vlgmr.msra.gmra.mrb[8].mxu1 %v528_v44  ;;  %999 = vmatmul.mubr.bf16.vlgmr.msra.gmra.mrb[8].mxu0 %v528_v44 }
 0x38e   :  { %v740_v54 = vpop.f32.mrb[8].mxu1  ;;  %v783_v55 = vpop.f32.mrb[8].mxu0 }
 0x38f   :  { %v741_v56 = vadd.f32 %v740_v54, %v566_v51  ;;  %v784_v57 = vadd.f32 %v783_v55, %v574_v52  ;;  %v742_v58 = vpop.f32.mrb[9].mxu1  ;;  %v1000_v59 = vpop.f32.mrb[9].mxu0 }
 0x390   :  { %v743_v60 = vadd.f32 %v742_v58, %v570_v53  ;;  %v744_v61 = vpop.f32.mrb[10].mxu1  ;;  %v786_v62 = vpop.f32.mrb[10].mxu0 }
 0x391   :  { %790 = vst [vmem:[#allocation2] sm:$0xff] %v741_v56  ;;  %792 = vst.msk [vmem:[#allocation2 + $0x10] sm:$0xff] %vm210_vm1, %v784_v57  ;;  %v745_v63 = vadd.f32 %v744_v61, %v566_v51  ;;  %v787_v0 = vadd.f32 %v786_v62, %v574_v52  ;;  %v746_v1 = vpop.f32.mrb[11].mxu1  ;;  %v1001_v3 = vpop.f32.mrb[11].mxu0 }
 0x392   :  { %791 = vst [vmem:[#allocation2 + $0x8] sm:$0xff] %v743_v60  ;;  %v747_v4 = vadd.f32 %v746_v1, %v570_v53 }
 0x393   :  { %793 = vst [vmem:[#allocation2 + $0x18] sm:$0xff] %v745_v63  ;;  %795 = vst.msk [vmem:[#allocation2 + $0x28] sm:$0xff] %vm210_vm1, %v787_v0 }
 0x394   :  { %794 = vst [vmem:[#allocation2 + $0x20] sm:$0xff] %v747_v4 }
 0x395   :  { %1087 = shalt.err (!%p1084_p4)
}
 0x396   :  { %s1088_s29 = scalar_lea.hbm %s1426_s9, 768 }
 0x397   :  { %p1089_p5 = scmp.ne.s32.totalorder %s1426_s9, %s1088_s29  ;;  %p1092_p6 = scmp.lt.u32.totalorder %s1088_s29, %s1426_s9 }
 0x399   :  { %p1094_p7 = pnand %p1092_p6, %p1089_p5 }
 0x39b   :  { %1097 = shalt.err (!%p1094_p7)
}
 0x39c   :  { %s1104_s12 = smov 384   ;;  %s1105_s5 = smov 24  }
 0x39d   :  { %807 = dma.vmem_to_hbm [thread:$0]  %s802_s26, 768, %s1426_s9, [#allocation3], %s1104_s12, %s1104_s12, %s1105_s5  }
 0x39e   :  { %1098 = dma.done.wait [#allocation3], 768  }
 0x39f   :  { %1099 = vsyncadd [#allocation3], 4294966528 }
 0x3a0   :  { %811 = vsyncpa [#allocation3], 1 }

</bundles_post_ra>
